<compile_context>
chip_gen: v5e
topology: v5e:2x2
jax: 0.10.0
libtpu: 0.0.40
codegen_flags: <defaults>
</compile_context>

<pallas_src>
import math

import jax
import jax.numpy as jnp
from jax.experimental import pallas as pl
from jax.experimental.pallas import tpu as pltpu


def _leaky_relu(x, negative_slope=0.2):
    return jnp.where(x > 0, x, negative_slope * x)


def discriminator_a_kernel(x_ref, w1_ref, b1_ref, w2_ref, b2_ref, w3t_ref,
                           b3_ref, o_ref):
    # fc1: Linear(Cin, 32) + LeakyReLU(0.2)
    h1 = jnp.dot(x_ref[...], w1_ref[...],
                 preferred_element_type=jnp.float32) + b1_ref[...]
    h1 = _leaky_relu(h1)
    # fc2: Linear(32, 64) + LeakyReLU(0.2)
    h2 = jnp.dot(h1, w2_ref[...],
                 preferred_element_type=jnp.float32) + b2_ref[...]
    h2 = _leaky_relu(h2)
    # fc3: Linear(64, 1).  Produce a lane-dense (1, TB) row directly:
    # (1, 64) @ (64, TB) — h2^T uses the XLU, which has plenty of slack here.
    y = jnp.dot(w3t_ref[...], h2.T,
                preferred_element_type=jnp.float32) + b3_ref[...]
    o_ref[...] = y[None].astype(o_ref.dtype)  # (1, 1, TB)


def _choose_batch_tile(batch, cin, dtype_bytes=4):
    """Pick a batch tile: double-buffered x tiles must fit v5e's 16 MiB scoped
    VMEM with comfortable headroom; keep tiles >=128 rows (lane-dense output)
    and <=1024 rows; never tile wider than the 128-padded batch."""
    budget = 8 * 1024 * 1024                      # bytes for 2x x-tile buffers
    tb = budget // (2 * max(cin, 1) * dtype_bytes)
    tb = max(128, min(1024, (tb // 128) * 128))
    b128 = ((batch + 127) // 128) * 128
    return min(tb, b128)


def discriminator_a_forward(x, params):
    """x: (B, Cin) float32 -> (B, 1) float32, fused 3-layer MLP kernel."""
    B, cin = x.shape
    tb = _choose_batch_tile(B, cin)
    num_tiles = pl.cdiv(B, tb)
    b_pad = num_tiles * tb
    if b_pad != B:
        x = jnp.pad(x, ((0, b_pad - B), (0, 0)))  # tail handling: pad, slice later

    const2 = lambda i: (0, 0)                     # weights stay resident in VMEM
    out = pl.pallas_call(
        discriminator_a_kernel,
        out_shape=jax.ShapeDtypeStruct((num_tiles, 1, tb), jnp.float32),
        grid_spec=pltpu.PrefetchScalarGridSpec(
            num_scalar_prefetch=0,
            grid=(num_tiles,),
            in_specs=[
                pl.BlockSpec((tb, cin), lambda i: (i, 0)),   # x tile (streamed)
                pl.BlockSpec((cin, 32), const2),             # w1
                pl.BlockSpec((1, 32), const2),               # b1
                pl.BlockSpec((32, 64), const2),              # w2
                pl.BlockSpec((1, 64), const2),               # b2
                pl.BlockSpec((1, 64), const2),               # w3 (PyTorch layout)
                pl.BlockSpec((1, 1), const2),                # b3
            ],
            out_specs=pl.BlockSpec((1, 1, tb), lambda i: (i, 0, 0)),
        ),
        compiler_params=pltpu.CompilerParams(
            dimension_semantics=("parallel",)),
    )(x, params["w1"], params["b1"], params["w2"], params["b2"],
      params["w3t"], params["b3"])
    return out.reshape(b_pad, 1)[:B]


def kaiming_normal(key, out_features, in_features):
    """PyTorch init.kaiming_normal_(a=0, mode='fan_in') for a Linear weight.
    Returns PyTorch layout (out_features, in_features)."""
    std = math.sqrt(2.0) / math.sqrt(in_features)
    return jax.random.normal(key, (out_features, in_features),
                             dtype=jnp.float32) * std


def make_params(key, inchannel):
    k1, k2, k3 = jax.random.split(key, 3)
    return {
        "w1": kaiming_normal(k1, 32, inchannel).T,   # (Cin, 32) for x @ W
        "b1": jnp.zeros((1, 32), jnp.float32),
        "w2": kaiming_normal(k2, 64, 32).T,          # (32, 64)
        "b2": jnp.zeros((1, 64), jnp.float32),
        "w3t": kaiming_normal(k3, 1, 64),            # (1, 64) PyTorch layout
        "b3": jnp.zeros((1, 1), jnp.float32),
    }


def reference_forward(x, params):
    h1 = _leaky_relu(x @ params["w1"] + params["b1"])
    h2 = _leaky_relu(h1 @ params["w2"] + params["b2"])
    return h2 @ params["w3t"].T + params["b3"]


if __name__ == "__main__":
    batch, inchannel = 2, 16
    key = jax.random.PRNGKey(0)
    kx, kp = jax.random.split(key)

    x = jax.random.normal(kx, (batch, inchannel), dtype=jnp.float32)
    params = make_params(kp, inchannel)

    out = jax.block_until_ready(discriminator_a_forward(x, params))
    ref = reference_forward(x, params)

    assert out.shape == (batch, 1), out.shape
    assert jnp.allclose(out, ref, atol=1e-4, rtol=1e-4), (out, ref)

    print("KERNEL_OK")
</pallas_src>

<mosaic_0001>
module attributes {stable_mosaic.version = 11 : i64} {
  func.func @discriminator_a_kernel(%arg0: i32, %arg1: memref<128x16xf32, #tpu.memory_space<vmem>>, %arg2: memref<16x32xf32, #tpu.memory_space<vmem>>, %arg3: memref<1x32xf32, #tpu.memory_space<vmem>>, %arg4: memref<32x64xf32, #tpu.memory_space<vmem>>, %arg5: memref<1x64xf32, #tpu.memory_space<vmem>>, %arg6: memref<1x64xf32, #tpu.memory_space<vmem>>, %arg7: memref<1x1xf32, #tpu.memory_space<vmem>>, %arg8: memref<1x1x128xf32, #tpu.memory_space<vmem>>) attributes {dimension_semantics = [#tpu.dimension_semantics<parallel>], iteration_bounds = array<i64: 1>, scalar_prefetch = 0 : i64, scratch_operands = 0 : i64, tpu.core_type = #tpu.core_type<tc>, window_params = [{transform_indices = @transform_0, window_bounds = array<i64: 128, 16>}, {pipeline_mode = #tpu.pipeline_mode<synchronous>, transform_indices = @transform_1, window_bounds = array<i64: 16, 32>}, {pipeline_mode = #tpu.pipeline_mode<synchronous>, transform_indices = @transform_2, window_bounds = array<i64: 1, 32>}, {pipeline_mode = #tpu.pipeline_mode<synchronous>, transform_indices = @transform_3, window_bounds = array<i64: 32, 64>}, {pipeline_mode = #tpu.pipeline_mode<synchronous>, transform_indices = @transform_4, window_bounds = array<i64: 1, 64>}, {pipeline_mode = #tpu.pipeline_mode<synchronous>, transform_indices = @transform_5, window_bounds = array<i64: 1, 64>}, {pipeline_mode = #tpu.pipeline_mode<synchronous>, transform_indices = @transform_6, window_bounds = array<i64: 1, 1>}, {transform_indices = @transform_7, window_bounds = array<i64: 1, 1, 128>}]} {
    %c0 = arith.constant 0 : index
    %c0_0 = arith.constant 0 : index
    %0 = vector.load %arg1[%c0, %c0_0] : memref<128x16xf32, #tpu.memory_space<vmem>>, vector<128x16xf32>
    %c0_1 = arith.constant 0 : index
    %c0_2 = arith.constant 0 : index
    %1 = vector.load %arg2[%c0_1, %c0_2] : memref<16x32xf32, #tpu.memory_space<vmem>>, vector<16x32xf32>
    %cst = arith.constant dense<0.000000e+00> : vector<128x32xf32>
    %2 = tpu.matmul %0, %1, %cst {dimension_numbers = #tpu.dot_dimension_numbers<[1], [0], [0], [1], [0, 0, 1, 1], [], []>} : vector<128x16xf32>, vector<16x32xf32>, vector<128x32xf32> -> vector<128x32xf32>
    %c0_3 = arith.constant 0 : index
    %c0_4 = arith.constant 0 : index
    %3 = vector.load %arg3[%c0_3, %c0_4] : memref<1x32xf32, #tpu.memory_space<vmem>>, vector<1x32xf32>
    %4 = vector.broadcast %3 : vector<1x32xf32> to vector<128x32xf32>
    %5 = arith.addf %2, %4 : vector<128x32xf32>
    %cst_5 = arith.constant 0.000000e+00 : f32
    %6 = vector.broadcast %cst_5 : f32 to vector<128x32xf32>
    %7 = arith.cmpf ogt, %5, %6 : vector<128x32xf32>
    %cst_6 = arith.constant 2.000000e-01 : f32
    %8 = vector.broadcast %cst_6 : f32 to vector<128x32xf32>
    %9 = arith.mulf %8, %5 : vector<128x32xf32>
    %10 = arith.select %7, %5, %9 : vector<128x32xi1>, vector<128x32xf32>
    %c0_7 = arith.constant 0 : index
    %c0_8 = arith.constant 0 : index
    %11 = vector.load %arg4[%c0_7, %c0_8] : memref<32x64xf32, #tpu.memory_space<vmem>>, vector<32x64xf32>
    %cst_9 = arith.constant dense<0.000000e+00> : vector<128x64xf32>
    %12 = tpu.matmul %10, %11, %cst_9 {dimension_numbers = #tpu.dot_dimension_numbers<[1], [0], [0], [1], [0, 0, 1, 1], [], []>} : vector<128x32xf32>, vector<32x64xf32>, vector<128x64xf32> -> vector<128x64xf32>
    %c0_10 = arith.constant 0 : index
    %c0_11 = arith.constant 0 : index
    %13 = vector.load %arg5[%c0_10, %c0_11] : memref<1x64xf32, #tpu.memory_space<vmem>>, vector<1x64xf32>
    %14 = vector.broadcast %13 : vector<1x64xf32> to vector<128x64xf32>
    %15 = arith.addf %12, %14 : vector<128x64xf32>
    %cst_12 = arith.constant 0.000000e+00 : f32
    %16 = vector.broadcast %cst_12 : f32 to vector<128x64xf32>
    %17 = arith.cmpf ogt, %15, %16 : vector<128x64xf32>
    %cst_13 = arith.constant 2.000000e-01 : f32
    %18 = vector.broadcast %cst_13 : f32 to vector<128x64xf32>
    %19 = arith.mulf %18, %15 : vector<128x64xf32>
    %20 = arith.select %17, %15, %19 : vector<128x64xi1>, vector<128x64xf32>
    %c0_14 = arith.constant 0 : index
    %c0_15 = arith.constant 0 : index
    %21 = vector.load %arg6[%c0_14, %c0_15] : memref<1x64xf32, #tpu.memory_space<vmem>>, vector<1x64xf32>
    %22 = tpu.transpose %20, [1, 0] : vector<128x64xf32> -> vector<64x128xf32>
    %cst_16 = arith.constant dense<0.000000e+00> : vector<1x128xf32>
    %23 = tpu.matmul %21, %22, %cst_16 {dimension_numbers = #tpu.dot_dimension_numbers<[1], [0], [0], [1], [0, 0, 1, 1], [], []>} : vector<1x64xf32>, vector<64x128xf32>, vector<1x128xf32> -> vector<1x128xf32>
    %c0_17 = arith.constant 0 : index
    %c0_18 = arith.constant 0 : index
    %24 = vector.load %arg7[%c0_17, %c0_18] : memref<1x1xf32, #tpu.memory_space<vmem>>, vector<1x1xf32>
    %25 = vector.broadcast %24 : vector<1x1xf32> to vector<1x128xf32>
    %26 = arith.addf %23, %25 : vector<1x128xf32>
    %27 = vector.shape_cast %26 : vector<1x128xf32> to vector<1x1x128xf32>
    %c0_19 = arith.constant 0 : index
    %c0_20 = arith.constant 0 : index
    %c0_21 = arith.constant 0 : index
    %28 = vector.load %arg8[%c0_19, %c0_20, %c0_21] : memref<1x1x128xf32, #tpu.memory_space<vmem>>, vector<1x1x128xf32>
    tpu.vector_store %arg8[%c0_19, %c0_20, %c0_21], %27 {strides = array<i32>} : memref<1x1x128xf32, #tpu.memory_space<vmem>>, vector<1x1x128xf32>,
    return
  }
  func.func @transform_0(%arg0: i32) -> (i32, i32) {
    %c0_i32 = arith.constant 0 : i32
    %c0_i32_0 = arith.constant 0 : i32
    return %arg0, %c0_i32 : i32, i32
  }
  func.func @transform_1(%arg0: i32) -> (i32, i32) {
    %c0_i32 = arith.constant 0 : i32
    %c0_i32_0 = arith.constant 0 : i32
    %c0_i32_1 = arith.constant 0 : i32
    return %c0_i32, %c0_i32_0 : i32, i32
  }
  func.func @transform_2(%arg0: i32) -> (i32, i32) {
    %c0_i32 = arith.constant 0 : i32
    %c0_i32_0 = arith.constant 0 : i32
    %c0_i32_1 = arith.constant 0 : i32
    return %c0_i32, %c0_i32_0 : i32, i32
  }
  func.func @transform_3(%arg0: i32) -> (i32, i32) {
    %c0_i32 = arith.constant 0 : i32
    %c0_i32_0 = arith.constant 0 : i32
    %c0_i32_1 = arith.constant 0 : i32
    return %c0_i32, %c0_i32_0 : i32, i32
  }
  func.func @transform_4(%arg0: i32) -> (i32, i32) {
    %c0_i32 = arith.constant 0 : i32
    %c0_i32_0 = arith.constant 0 : i32
    %c0_i32_1 = arith.constant 0 : i32
    return %c0_i32, %c0_i32_0 : i32, i32
  }
  func.func @transform_5(%arg0: i32) -> (i32, i32) {
    %c0_i32 = arith.constant 0 : i32
    %c0_i32_0 = arith.constant 0 : i32
    %c0_i32_1 = arith.constant 0 : i32
    return %c0_i32, %c0_i32_0 : i32, i32
  }
  func.func @transform_6(%arg0: i32) -> (i32, i32) {
    %c0_i32 = arith.constant 0 : i32
    %c0_i32_0 = arith.constant 0 : i32
    %c0_i32_1 = arith.constant 0 : i32
    return %c0_i32, %c0_i32_0 : i32, i32
  }
  func.func @transform_7(%arg0: i32) -> (i32, i32, i32) {
    %c0_i32 = arith.constant 0 : i32
    %c0_i32_0 = arith.constant 0 : i32
    %c0_i32_1 = arith.constant 0 : i32
    return %arg0, %c0_i32, %c0_i32_0 : i32, i32, i32
  }
}

</mosaic_0001>

<bundles_post_ra>
// kernel: tpu_custom_call.1
= control target key start
LH: loop header
LB: loop body
LE: loop exit
PB: predicated region body
PF: predicated region fallthrough
CT: control target
= control target key end

     0   :  { %s789_s0 = inlined_call_operand.vmem [shape: f32[128,16], index: 0, kind: input, shape index: {}]   ;;  %s790_s1 = inlined_call_operand.vmem [shape: f32[16,32], index: 1, kind: input, shape index: {}]   ;;  %s791_s2 = inlined_call_operand.vmem [shape: f32[1,32], index: 2, kind: input, shape index: {}]   ;;  %s792_s3 = inlined_call_operand.vmem [shape: f32[32,64], index: 3, kind: input, shape index: {}]   ;;  %s793_s4 = inlined_call_operand.vmem [shape: f32[1,64], index: 4, kind: input, shape index: {}]   ;;  %s794_s5 = inlined_call_operand.vmem [shape: f32[1,64], index: 5, kind: input, shape index: {}]   ;;  %s795_s6 = inlined_call_operand.<no memory space> [shape: f32[1,1], index: 6, kind: input, shape index: {}]   ;;  %s796_s7 = inlined_call_operand.hbm [shape: f32[1,1,128], index: 7, kind: output, shape index: {}]  }
   0x1   :  { %v12_v0 = vstv %s795_s6 }
   0x2   :  { %13 = vst [vmem:[#allocation2] sm:$0x1] %v12_v0 }
   0x3   :  { %v46_v1 = vld [vmem:[%s790_s1 + $0x8] sm:$0xff]  ;;  %v45_v2 = vld [vmem:[%s790_s1] sm:$0xff]  ;;  %vm51_vm0 = vcmask 130048  }
   0x4   :  { %114 = vmatpush.msra.mxu0 %v46_v1  ;;  %v29_v3 = vld [vmem:[%s789_s0] sm:$0xff]  ;;  %529 = vmatpush.msra.mxu3 %v46_v1 }
   0x6   :  { %115 = vmatpush.msra.mxu0 %v45_v2  ;;  %530 = vmatpush.msra.mxu3 %v45_v2 }
   0x7   :  { %14 = vsyncpa [#allocation4], 0  ;;  %480 = vmatmul.msk.f32.vlgmr.msra.gmra.mxu0 %vm51_vm0, %v29_v3  ;;  %v30_v4 = vld [vmem:[%s789_s0 + $0x8] sm:$0xff]  ;;  %v31_v5 = vld [vmem:[%s789_s0 + $0x10] sm:$0xff]  ;;  %vm221_vm2 = vcmask 261120   ;;  %s567_s22 = smov [#allocation3]  }
   0x8   :  { %v32_v6 = vld [vmem:[%s789_s0 + $0x18] sm:$0xff]  ;;  %v33_v7 = vld [vmem:[%s789_s0 + $0x20] sm:$0xff]  ;;  %v34_v8 = vld [vmem:[%s789_s0 + $0x28] sm:$0xff]  ;;  %s469_s23 = sshll.u32 %s567_s22, 4  ;;  %s471_s26 = sshll.u32 %s796_s7, 4  ;;  %s470_s23 = int_to_ptr.vmem [resolvable:$true] %s469_s23  ;;  %s472_s26 = int_to_ptr.hbm [resolvable:$true] %s471_s26 }
   0x9   :  { %v35_v9 = vld [vmem:[%s789_s0 + $0x30] sm:$0xff]  ;;  %v40_v10 = vld [vmem:[%s789_s0 + $0x58] sm:$0xff]  ;;  %v41_v13 = vld [vmem:[%s789_s0 + $0x60] sm:$0xff] }
   0xa   :  { %491 = vmatmul.msk.f32.vlgmr.msra.gmra.mxu3 %vm51_vm0, %v40_v10  ;;  %v216_v11 = vld [vmem:[%s792_s3 + $0x18] sm:$0xff]  ;;  %v37_v14 = vld [vmem:[%s789_s0 + $0x40] sm:$0xff]  ;;  %v42_v15 = vld [vmem:[%s789_s0 + $0x68] sm:$0xff] }
   0xb   :  { %282 = vmatpush.msra.mxu1 %v216_v11  ;;  %531 = vmatpush.msrb.mxu3 %v216_v11  ;;  %v36_v12 = vld [vmem:[%s789_s0 + $0x38] sm:$0xff]  ;;  %v38_v16 = vld [vmem:[%s789_s0 + $0x48] sm:$0xff]  ;;  %v43_v17 = vld [vmem:[%s789_s0 + $0x70] sm:$0xff] }
   0xc   :  { %v39_v18 = vld [vmem:[%s789_s0 + $0x50] sm:$0xff]  ;;  %v44_v19 = vld [vmem:[%s789_s0 + $0x78] sm:$0xff]  ;;  %v214_v21 = vld [vmem:[%s792_s3 + $0x8] sm:$0xff] }
   0xd   :  { %v215_v20 = vld [vmem:[%s792_s3 + $0x10] sm:$0xff]  ;;  %v213_v22 = vld [vmem:[%s792_s3] sm:$0xff] }
   0xe   :  { %283 = vmatpush.msra.mxu1 %v215_v20  ;;  %532 = vmatpush.msrb.mxu3 %v215_v20  ;;  %v696_v23 = vld [vmem:[%s791_s2] ss:$0 sm:$0xff] }
   0xf   :  { %481 = vmatmul.msk.f32.gmra.mxu0 %vm51_vm0, %v30_v4 }
  0x10   :  { %284 = vmatpush.msra.mxu1 %v214_v21  ;;  %533 = vmatpush.msrb.mxu3 %v214_v21 }
  0x12   :  { %492 = vmatmul.msk.f32.gmra.mxu3 %vm51_vm0, %v41_v13  ;;  %285 = vmatpush.msra.mxu1 %v213_v22 }
  0x13   :  { %534 = vmatpush.msrb.mxu3 %v213_v22 }
  0x17   :  { %482 = vmatmul.msk.f32.gmra.mxu0 %vm51_vm0, %v31_v5 }
  0x1a   :  { %493 = vmatmul.msk.f32.gmra.mxu3 %vm51_vm0, %v42_v15 }
  0x1f   :  { %483 = vmatmul.msk.f32.gmra.mxu0 %vm51_vm0, %v32_v6 }
  0x22   :  { %494 = vmatmul.msk.f32.gmra.mxu3 %vm51_vm0, %v43_v17 }
  0x27   :  { %484 = vmatmul.msk.f32.gmra.mxu0 %vm51_vm0, %v33_v7 }
  0x2a   :  { %495 = vmatmul.msk.f32.gmra.mxu3 %vm51_vm0, %v44_v19 }
  0x2f   :  { %485 = vmatmul.msk.f32.gmra.mxu0 %vm51_vm0, %v34_v8 }
  0x37   :  { %486 = vmatmul.msk.f32.gmra.mxu0 %vm51_vm0, %v35_v9 }
  0x3f   :  { %487 = vmatmul.msk.f32.gmra.mxu0 %vm51_vm0, %v36_v12 }
  0x47   :  { %488 = vmatmul.msk.f32.gmra.mxu0 %vm51_vm0, %v37_v14 }
  0x4f   :  { %489 = vmatmul.msk.f32.gmra.mxu0 %vm51_vm0, %v38_v16 }
  0x57   :  { %490 = vmatmul.msk.f32.gmra.mxu0 %vm51_vm0, %v39_v18 }
  0x84   :  { %v117_v24 = vpop.f32.mrf.mxu0 }
  0x85   :  { %v118_v25 = vadd.f32 %v696_v23, %v117_v24 }
  0x87   :  { %v181_v26 = vmul.f32 0.2, %v118_v25  ;;  %vm165_vm1 = vcmp.gt.f32.partialorder %v118_v25, 0.0 }
  0x89   :  { %v197_v27 = vsel %vm165_vm1, %v118_v25, %v181_v26 }
  0x8a   :  { %496 = vmatmul.msk.f32.vlgmr.msra.gmra.mxu1 %vm221_vm2, %v197_v27 }
  0x8c   :  { %v120_v28 = vpop.f32.mrf.mxu0 }
  0x8d   :  { %v121_v29 = vadd.f32 %v696_v23, %v120_v28  ;;  %v150_v62 = vpop.f32.mrf.mxu3 }
  0x8e   :  { %v151_v5 = vadd.f32 %v696_v23, %v150_v62 }
  0x8f   :  { %v182_v30 = vmul.f32 0.2, %v121_v29  ;;  %vm166_vm3 = vcmp.gt.f32.partialorder %v121_v29, 0.0 }
  0x90   :  { %v192_v7 = vmul.f32 0.2, %v151_v5  ;;  %vm176_vm13 = vcmp.gt.f32.partialorder %v151_v5, 0.0 }
  0x91   :  { %v198_v31 = vsel %vm166_vm3, %v121_v29, %v182_v30  ;;  %vm391_vm3 = vcmask 523264  }
  0x92   :  { %497 = vmatmul.msk.f32.gmra.mxu1 %vm221_vm2, %v198_v31  ;;  %v208_v9 = vsel %vm176_vm13, %v151_v5, %v192_v7  ;;  %v384_v7 = vld [vmem:[#allocation2] sm:$0x1] }
  0x94   :  { %v123_v32 = vpop.f32.mrf.mxu0 }
  0x95   :  { %v124_v33 = vadd.f32 %v696_v23, %v123_v32  ;;  %v153_v4 = vpop.f32.mrf.mxu3 }
  0x96   :  { %v154_v8 = vadd.f32 %v696_v23, %v153_v4 }
  0x97   :  { %v183_v34 = vmul.f32 0.2, %v124_v33  ;;  %vm167_vm4 = vcmp.gt.f32.partialorder %v124_v33, 0.0 }
  0x98   :  { %v193_v11 = vmul.f32 0.2, %v154_v8  ;;  %vm177_vm14 = vcmp.gt.f32.partialorder %v154_v8, 0.0 }
  0x99   :  { %v199_v35 = vsel %vm167_vm4, %v124_v33, %v183_v34 }
  0x9a   :  { %498 = vmatmul.msk.f32.gmra.mxu1 %vm221_vm2, %v199_v35  ;;  %v209_v13 = vsel %vm177_vm14, %v154_v8, %v193_v11  ;;  %v566_v8 = vmov 0  }
  0x9b   :  { %537 = vset.pattern.permute.xlu0 %v566_v8 }
  0x9c   :  { %v126_v36 = vpop.f32.mrf.mxu0  ;;  %387 = vperm.xlu0 %537, %v384_v7  }
  0x9d   :  { %v127_v37 = vadd.f32 %v696_v23, %v126_v36  ;;  %v156_v10 = vpop.f32.mrf.mxu3 }
  0x9e   :  { %v157_v12 = vadd.f32 %v696_v23, %v156_v10 }
  0x9f   :  { %v184_v38 = vmul.f32 0.2, %v127_v37  ;;  %vm168_vm5 = vcmp.gt.f32.partialorder %v127_v37, 0.0 }
  0xa0   :  { %v194_v15 = vmul.f32 0.2, %v157_v12  ;;  %vm178_vm15 = vcmp.gt.f32.partialorder %v157_v12, 0.0 }
  0xa1   :  { %v200_v39 = vsel %vm168_vm5, %v127_v37, %v184_v38  ;;  %v743_v37 = vld [vmem:[%s793_s4] ss:$0 sm:$0xff] }
  0xa2   :  { %499 = vmatmul.msk.f32.gmra.mxu1 %vm221_vm2, %v200_v39  ;;  %v210_v17 = vsel %vm178_vm15, %v157_v12, %v194_v15 }
  0xa4   :  { %v129_v40 = vpop.f32.mrf.mxu0 }
  0xa5   :  { %v130_v41 = vadd.f32 %v696_v23, %v129_v40  ;;  %v159_v14 = vpop.f32.mrf.mxu3 }
  0xa6   :  { %v160_v16 = vadd.f32 %v696_v23, %v159_v14 }
  0xa7   :  { %v185_v42 = vmul.f32 0.2, %v130_v41  ;;  %vm169_vm6 = vcmp.gt.f32.partialorder %v130_v41, 0.0 }
  0xa8   :  { %v195_v18 = vmul.f32 0.2, %v160_v16  ;;  %vm179_vm0 = vcmp.gt.f32.partialorder %v160_v16, 0.0 }
  0xa9   :  { %v201_v43 = vsel %vm169_vm6, %v130_v41, %v185_v42 }
  0xaa   :  { %500 = vmatmul.msk.f32.gmra.mxu1 %vm221_vm2, %v201_v43  ;;  %v211_v21 = vsel %vm179_vm0, %v160_v16, %v195_v18 }
  0xac   :  { %v132_v44 = vpop.f32.mrf.mxu0 }
  0xad   :  { %v133_v45 = vadd.f32 %v696_v23, %v132_v44  ;;  %v162_v19 = vpop.f32.mrf.mxu3 }
  0xae   :  { %v163_v20 = vadd.f32 %v696_v23, %v162_v19 }
  0xaf   :  { %v186_v46 = vmul.f32 0.2, %v133_v45  ;;  %vm170_vm7 = vcmp.gt.f32.partialorder %v133_v45, 0.0 }
  0xb0   :  { %v196_v22 = vmul.f32 0.2, %v163_v20  ;;  %vm180_vm1 = vcmp.gt.f32.partialorder %v163_v20, 0.0 }
  0xb1   :  { %v202_v47 = vsel %vm170_vm7, %v133_v45, %v186_v46 }
  0xb2   :  { %501 = vmatmul.msk.f32.gmra.mxu1 %vm221_vm2, %v202_v47  ;;  %v212_v24 = vsel %vm180_vm1, %v163_v20, %v196_v22 }
  0xb4   :  { %v135_v48 = vpop.f32.mrf.mxu0 }
  0xb5   :  { %v136_v49 = vadd.f32 %v696_v23, %v135_v48 }
  0xb7   :  { %v187_v50 = vmul.f32 0.2, %v136_v49  ;;  %vm171_vm8 = vcmp.gt.f32.partialorder %v136_v49, 0.0 }
  0xb9   :  { %v203_v51 = vsel %vm171_vm8, %v136_v49, %v187_v50 }
  0xba   :  { %502 = vmatmul.msk.f32.gmra.mxu1 %vm221_vm2, %v203_v51 }
  0xbc   :  { %v138_v52 = vpop.f32.mrf.mxu0 }
  0xbd   :  { %v139_v53 = vadd.f32 %v696_v23, %v138_v52 }
  0xbf   :  { %v188_v54 = vmul.f32 0.2, %v139_v53  ;;  %vm172_vm9 = vcmp.gt.f32.partialorder %v139_v53, 0.0 }
  0xc1   :  { %v204_v55 = vsel %vm172_vm9, %v139_v53, %v188_v54 }
  0xc2   :  { %503 = vmatmul.msk.f32.gmra.mxu1 %vm221_vm2, %v204_v55 }
  0xc4   :  { %v141_v56 = vpop.f32.mrf.mxu0 }
  0xc5   :  { %v142_v57 = vadd.f32 %v696_v23, %v141_v56 }
  0xc7   :  { %v189_v58 = vmul.f32 0.2, %v142_v57  ;;  %vm173_vm10 = vcmp.gt.f32.partialorder %v142_v57, 0.0 }
  0xc9   :  { %v205_v59 = vsel %vm173_vm10, %v142_v57, %v189_v58 }
  0xca   :  { %504 = vmatmul.msk.f32.gmra.mxu1 %vm221_vm2, %v205_v59 }
  0xcc   :  { %v144_v60 = vpop.f32.mrf.mxu0 }
  0xcd   :  { %v145_v61 = vadd.f32 %v696_v23, %v144_v60 }
  0xcf   :  { %v190_v63 = vmul.f32 0.2, %v145_v61  ;;  %vm174_vm11 = vcmp.gt.f32.partialorder %v145_v61, 0.0 }
  0xd1   :  { %v206_v0 = vsel %vm174_vm11, %v145_v61, %v190_v63 }
  0xd2   :  { %505 = vmatmul.msk.f32.gmra.mxu1 %vm221_vm2, %v206_v0 }
  0xd4   :  { %v147_v1 = vpop.f32.mrf.mxu0 }
  0xd5   :  { %v148_v2 = vadd.f32 %v696_v23, %v147_v1 }
  0xd7   :  { %vm175_vm12 = vcmp.gt.f32.partialorder %v148_v2, 0.0  ;;  %v191_v3 = vmul.f32 0.2, %v148_v2 }
  0xd9   :  { %v207_v6 = vsel %vm175_vm12, %v148_v2, %v191_v3 }
  0xda   :  { %506 = vmatmul.msk.f32.vlgmr.msrb.gmra.mxu3 %vm221_vm2, %v207_v6 }
  0xe2   :  { %507 = vmatmul.msk.f32.gmra.mxu3 %vm221_vm2, %v208_v9 }
  0xea   :  { %508 = vmatmul.msk.f32.gmra.mxu3 %vm221_vm2, %v209_v13 }
  0xf2   :  { %509 = vmatmul.msk.f32.gmra.mxu3 %vm221_vm2, %v210_v17 }
  0xfa   :  { %510 = vmatmul.msk.f32.gmra.mxu3 %vm221_vm2, %v211_v21 }
 0x102   :  { %511 = vmatmul.msk.f32.gmra.mxu3 %vm221_vm2, %v212_v24 }
 0x107   :  { %v730_v25 = vpop.f32.mrf.mxu1 }
 0x108   :  { %v288_v21 = vadd.f32 %v743_v37, %v730_v25 }
 0x10e   :  { %v388_v25 = vpop.permute.xlu0 %387 }
 0x10f   :  { %v732_v26 = vpop.f32.mrf.mxu1 }
 0x110   :  { %v291_v18 = vadd.f32 %v743_v37, %v732_v26  ;;  %v383_v26 = vld [vmem:[%s794_s5] sm:$0x1] }
 0x112   :  { %v352_v22 = vmul.f32 0.2, %v291_v18  ;;  %vm336_vm1 = vcmp.gt.f32.partialorder %v291_v18, 0.0 }
 0x117   :  { %v734_v27 = vpop.f32.mrf.mxu1 }
 0x118   :  { %v294_v15 = vadd.f32 %v743_v37, %v734_v27  ;;  %v351_v27 = vmul.f32 0.2, %v288_v21 }
 0x11a   :  { %v353_v19 = vmul.f32 0.2, %v294_v15  ;;  %vm337_vm0 = vcmp.gt.f32.partialorder %v294_v15, 0.0 }
 0x11c   :  { %v369_v24 = vsel %vm337_vm0, %v294_v15, %v353_v19 }
 0x11f   :  { %v736_v28 = vpop.f32.mrf.mxu1 }
 0x120   :  { %v297_v12 = vadd.f32 %v743_v37, %v736_v28  ;;  %v368_v28 = vsel %vm336_vm1, %v291_v18, %v352_v22 }
 0x122   :  { %v354_v16 = vmul.f32 0.2, %v297_v12  ;;  %vm338_vm15 = vcmp.gt.f32.partialorder %v297_v12, 0.0 }
 0x124   :  { %v370_v20 = vsel %vm338_vm15, %v297_v12, %v354_v16 }
 0x127   :  { %v738_v30 = vpop.f32.mrf.mxu1 }
 0x128   :  { %v300_v9 = vadd.f32 %v743_v37, %v738_v30  ;;  %v390_v30 = vperm.slane %v388_v25, 0 }
 0x12a   :  { %v355_v13 = vmul.f32 0.2, %v300_v9  ;;  %vm339_vm14 = vcmp.gt.f32.partialorder %v300_v9, 0.0 }
 0x12c   :  { %v371_v17 = vsel %vm339_vm14, %v300_v9, %v355_v13 }
 0x12f   :  { %v302_v32 = vpop.f32.mrf.mxu1 }
 0x130   :  { %v303_v4 = vadd.f32 %v743_v37, %v302_v32 }
 0x132   :  { %v356_v10 = vmul.f32 0.2, %v303_v4  ;;  %vm340_vm13 = vcmp.gt.f32.partialorder %v303_v4, 0.0 }
 0x134   :  { %v372_v14 = vsel %vm340_vm13, %v303_v4, %v356_v10 }
 0x137   :  { %v305_v34 = vpop.f32.mrf.mxu1 }
 0x138   :  { %v306_v1 = vadd.f32 %v743_v37, %v305_v34 }
 0x13a   :  { %v357_v5 = vmul.f32 0.2, %v306_v1  ;;  %vm341_vm12 = vcmp.gt.f32.partialorder %v306_v1, 0.0 }
 0x13c   :  { %v373_v11 = vsel %vm341_vm12, %v306_v1, %v357_v5 }
 0x13f   :  { %v308_v36 = vpop.f32.mrf.mxu1 }
 0x140   :  { %v309_v62 = vadd.f32 %v743_v37, %v308_v36 }
 0x142   :  { %v358_v2 = vmul.f32 0.2, %v309_v62  ;;  %vm342_vm11 = vcmp.gt.f32.partialorder %v309_v62, 0.0 }
 0x144   :  { %v374_v6 = vsel %vm342_vm11, %v309_v62, %v358_v2 }
 0x147   :  { %v311_v45 = vpop.f32.mrf.mxu1 }
 0x148   :  { %v312_v59 = vadd.f32 %v743_v37, %v311_v45 }
 0x14a   :  { %v359_v63 = vmul.f32 0.2, %v312_v59  ;;  %vm343_vm10 = vcmp.gt.f32.partialorder %v312_v59, 0.0 }
 0x14c   :  { %v375_v3 = vsel %vm343_vm10, %v312_v59, %v359_v63 }
 0x14f   :  { %v314_v55 = vpop.f32.mrf.mxu1 }
 0x150   :  { %v315_v56 = vadd.f32 %v743_v37, %v314_v55 }
 0x152   :  { %v360_v60 = vmul.f32 0.2, %v315_v56  ;;  %vm344_vm9 = vcmp.gt.f32.partialorder %v315_v56, 0.0 }
 0x154   :  { %v376_v0 = vsel %vm344_vm9, %v315_v56, %v360_v60 }
 0x15d   :  { %v317_v29 = vpop.f32.mrf.mxu3 }
 0x15e   :  { %v318_v52 = vadd.f32 %v743_v37, %v317_v29 }
 0x160   :  { %v361_v57 = vmul.f32 0.2, %v318_v52  ;;  %vm345_vm8 = vcmp.gt.f32.partialorder %v318_v52, 0.0 }
 0x162   :  { %v377_v61 = vsel %vm345_vm8, %v318_v52, %v361_v57 }
 0x165   :  { %v320_v23 = vpop.f32.mrf.mxu3 }
 0x166   :  { %v321_v49 = vadd.f32 %v743_v37, %v320_v23 }
 0x168   :  { %v362_v53 = vmul.f32 0.2, %v321_v49  ;;  %vm346_vm7 = vcmp.gt.f32.partialorder %v321_v49, 0.0 }
 0x16a   :  { %v378_v58 = vsel %vm346_vm7, %v321_v49, %v362_v53 }
 0x16d   :  { %v323_v31 = vpop.f32.mrf.mxu3 }
 0x16e   :  { %v324_v46 = vadd.f32 %v743_v37, %v323_v31 }
 0x170   :  { %v363_v50 = vmul.f32 0.2, %v324_v46  ;;  %vm347_vm6 = vcmp.gt.f32.partialorder %v324_v46, 0.0 }
 0x172   :  { %v379_v54 = vsel %vm347_vm6, %v324_v46, %v363_v50 }
 0x175   :  { %v326_v33 = vpop.f32.mrf.mxu3 }
 0x176   :  { %v327_v42 = vadd.f32 %v743_v37, %v326_v33 }
 0x178   :  { %v364_v47 = vmul.f32 0.2, %v327_v42  ;;  %vm348_vm5 = vcmp.gt.f32.partialorder %v327_v42, 0.0 }
 0x17a   :  { %v380_v51 = vsel %vm348_vm5, %v327_v42, %v364_v47 }
 0x17d   :  { %v329_v35 = vpop.f32.mrf.mxu3 }
 0x17e   :  { %v330_v39 = vadd.f32 %v743_v37, %v329_v35 }
 0x180   :  { %v365_v43 = vmul.f32 0.2, %v330_v39  ;;  %vm349_vm4 = vcmp.gt.f32.partialorder %v330_v39, 0.0 }
 0x182   :  { %v381_v48 = vsel %vm349_vm4, %v330_v39, %v365_v43 }
 0x185   :  { %v332_v38 = vpop.f32.mrf.mxu3 }
 0x186   :  { %v333_v40 = vadd.f32 %v743_v37, %v332_v38 }
 0x188   :  { %vm350_vm2 = vcmp.gt.f32.partialorder %v333_v40, 0.0  ;;  %v366_v41 = vmul.f32 0.2, %v333_v40 }
 0x18a   :  { %v382_v44 = vsel %vm350_vm2, %v333_v40, %v366_v41  ;;  %vm335_vm2 = vcmp.gt.f32.partialorder %v288_v21, 0.0 }
 0x18b   :  { %512 = vmatpush.xpose.msk.msra.mxu2 %vm391_vm3, %v382_v44  ;;  %v367_v29 = vsel %vm335_vm2, %v288_v21, %v351_v27 }
 0x18f   :  { %513 = vmatpush.xpose.msk.msra.mxu2 %vm391_vm3, %v381_v48 }
 0x193   :  { %514 = vmatpush.xpose.msk.msra.mxu2 %vm391_vm3, %v380_v51 }
 0x197   :  { %515 = vmatpush.xpose.msk.msra.mxu2 %vm391_vm3, %v379_v54 }
 0x19b   :  { %516 = vmatpush.xpose.msk.msra.mxu2 %vm391_vm3, %v378_v58 }
 0x19f   :  { %517 = vmatpush.xpose.msk.msra.mxu2 %vm391_vm3, %v377_v61 }
 0x1a3   :  { %518 = vmatpush.xpose.msk.msra.mxu2 %vm391_vm3, %v376_v0 }
 0x1a7   :  { %519 = vmatpush.xpose.msk.msra.mxu2 %vm391_vm3, %v375_v3 }
 0x1ab   :  { %520 = vmatpush.xpose.msk.msra.mxu2 %vm391_vm3, %v374_v6 }
 0x1af   :  { %521 = vmatpush.xpose.msk.msra.mxu2 %vm391_vm3, %v373_v11 }
 0x1b3   :  { %522 = vmatpush.xpose.msk.msra.mxu2 %vm391_vm3, %v372_v14 }
 0x1b7   :  { %523 = vmatpush.xpose.msk.msra.mxu2 %vm391_vm3, %v371_v17 }
 0x1bb   :  { %524 = vmatpush.xpose.msk.msra.mxu2 %vm391_vm3, %v370_v20 }
 0x1bf   :  { %525 = vmatpush.xpose.msk.msra.mxu2 %vm391_vm3, %v369_v24 }
 0x1c3   :  { %526 = vmatpush.xpose.msk.msra.mxu2 %vm391_vm3, %v368_v28 }
 0x1c7   :  { %527 = vmatpush.xpose.msk.msra.mxu2 %vm391_vm3, %v367_v29 }
 0x1ca   :  { %528 = vmatmul.msk.f32.vlgmr.msra.gmra.mxu2 %vm391_vm3, %v383_v26 }
 0x24d   :  { %v460_v23 = vpop.f32.mrf.mxu2 }
 0x24e   :  { %v461_v31 = vadd.f32 %v460_v23, %v390_v30 }
 0x250   :  { %463 = vst [vmem:[#allocation3] sm:$0x1] %v461_v31 }
 0x251   :  { %474 = dma.vmem_to_hbm [thread:$0]  %s470_s23, 16, %s472_s26, [#allocation4]  }
 0x252   :  { %564 = dma.done.wait [#allocation4], 16  }
 0x253   :  { %565 = vsyncadd [#allocation4], 4294967280 }
 0x254   :  { %479 = vsyncpa [#allocation4], 1 }

</bundles_post_ra>
